<compile_context>
chip_gen: v5e
topology: v5e:2x2
jax: 0.10.0
libtpu: 0.0.40
codegen_flags: <defaults>
</compile_context>

<pallas_src>
import jax
import jax.numpy as jnp
from jax import lax
from jax.experimental import pallas as pl
from jax.experimental.pallas import tpu as pltpu


_LANE = 128
_SUBLANE = 8
_ONEHOT_MAX_ROWS = 4096        # one-hot MXU gather only for small tables
_ROWS_PER_STEP = 8             # rows gathered per grid step on the fallback path


def _round_up(x: int, m: int) -> int:
    return m * pl.cdiv(int(x), m)


def _vmem_capacity_bytes() -> int:
    """Per-TensorCore VMEM (generation aware: 128 MiB v5e/v6e, 64 MiB v7x)."""
    try:
        return int(pltpu.get_tpu_info().vmem_capacity_bytes)
    except Exception:
        return 64 * 1024 * 1024   # conservative default (v7x per-core)


# ---------------------------------------------------------------------------
# Path A: table resident in VMEM, vectorized one-hot gather on the (idle) MXU.
# ---------------------------------------------------------------------------
def _onehot_gather_kernel(ids_ref, table_ref, out_ref):
    # ids_ref:   VMEM (tile_n, 1)        int32
    # table_ref: VMEM (rows_p, d_pad)    full table, constant block index
    # out_ref:   VMEM (tile_n, d_pad)    lane/sublane-dense output tile
    tile_n = out_ref.shape[0]
    rows_p = table_ref.shape[0]
    ids = ids_ref[...]                                            # (tile_n, 1)
    row_iota = lax.broadcasted_iota(jnp.int32, (tile_n, rows_p), 1)
    onehot = jnp.where(ids == row_iota,
                       jnp.float32(1.0), jnp.float32(0.0))        # (tile_n, rows_p)
    gathered = jnp.dot(onehot, table_ref[...].astype(jnp.float32),
                       preferred_element_type=jnp.float32)
    out_ref[...] = gathered.astype(out_ref.dtype)


def _onehot_table_gather(table, ids, *, vmem_limit_bytes, tile_n=None):
    rows_p, d_pad = table.shape
    n = int(ids.shape[0])

    if tile_n is None:
        # Vectorized gather => larger tiles are nearly free; bounded by the
        # 2 * tile_n * d_pad * 4 B output double buffer.
        tile_n = min(256, _round_up(n, _SUBLANE))
    tile_n = max(_SUBLANE, (int(tile_n) // _SUBLANE) * _SUBLANE)

    n_pad = _round_up(n, tile_n)
    if n_pad != n:
        ids = jnp.pad(ids, (0, n_pad - n))        # pad with row 0, sliced off below
    ids2d = ids.reshape(n_pad, 1)

    grid = (n_pad // tile_n,)
    ids_spec = pl.BlockSpec((tile_n, 1), lambda i: (i, 0))
    out_spec = pl.BlockSpec((tile_n, d_pad), lambda i: (i, 0))
    out_shape = jax.ShapeDtypeStruct((n_pad, d_pad), table.dtype)
    cparams = pltpu.CompilerParams(
        dimension_semantics=("parallel",),        # independent tiles -> 2 TCs on v7x
        vmem_limit_bytes=int(vmem_limit_bytes),
    )

    def run(table_spec):
        return pl.pallas_call(
            _onehot_gather_kernel,
            grid=grid,
            in_specs=[ids_spec, table_spec],
            out_specs=out_spec,
            out_shape=out_shape,
            compiler_params=cparams,
        )(ids2d, table)

    try:
        # Constant block index => single-buffer the resident table (double
        # buffering it buys nothing and doubles its VMEM footprint).
        out = run(pl.BlockSpec((rows_p, d_pad), lambda i: (0, 0),
                               pipeline_mode=pl.Buffered(1)))
    except Exception:
        out = run(pl.BlockSpec((rows_p, d_pad), lambda i: (0, 0)))
    return out[:n]


# ---------------------------------------------------------------------------
# Path B (fallback for tables too large for VMEM / one-hot): pipelined row-DMA
# gather, 8 rows per grid step via 8 data-dependent row BlockSpecs, one dense
# (8, D) output tile per step.
# ---------------------------------------------------------------------------
def _rowdma_gather_kernel(ids_ref, *refs):
    del ids_ref                                   # consumed by the index_maps
    row_refs, out_ref = refs[:-1], refs[-1]
    # Single sublane-dense store per step (no masked 1-row vst).
    out_ref[...] = jnp.concatenate([r[...] for r in row_refs], axis=0)


def _rowdma_gather(table, ids, *, vmem_limit_bytes):
    rows_p, d_pad = table.shape
    n = int(ids.shape[0])
    n_pad = _round_up(n, _ROWS_PER_STEP)
    if n_pad != n:
        ids = jnp.pad(ids, (0, n_pad - n))

    def make_row_spec(k):
        return pl.BlockSpec(
            (1, d_pad), lambda i, ids_s, k=k: (ids_s[_ROWS_PER_STEP * i + k], 0))

    in_specs = [make_row_spec(k) for k in range(_ROWS_PER_STEP)]

    # TODO(synk): manual double-buffered multi-row DMA gather (P4) with
    # memory_space=pl.ANY + make_async_copy for very large tables.
    out = pl.pallas_call(
        _rowdma_gather_kernel,
        grid_spec=pltpu.PrefetchScalarGridSpec(
            num_scalar_prefetch=1,                 # ids land in SMEM
            grid=(n_pad // _ROWS_PER_STEP,),
            in_specs=in_specs,
            out_specs=pl.BlockSpec((_ROWS_PER_STEP, d_pad), lambda i, ids_s: (i, 0)),
        ),
        out_shape=jax.ShapeDtypeStruct((n_pad, d_pad), table.dtype),
        compiler_params=pltpu.CompilerParams(
            dimension_semantics=("parallel",),
            vmem_limit_bytes=int(vmem_limit_bytes),
        ),
    )(ids, table, *([table] * (_ROWS_PER_STEP - 1)))
    return out[:n]


# ---------------------------------------------------------------------------
# Public wrapper.
# ---------------------------------------------------------------------------
def embedding_lookup(table: jax.Array, node_ids: jax.Array,
                     out_dim: int | None = None) -> jax.Array:
    """out[i, :out_dim] = table[node_ids[i], :out_dim]  (Pallas TPU gather).

    `table` should already be padded to lane/sublane multiples (done once in
    EmbeddingEncoder.__init__); padding here is only a fallback for raw tables.
    """
    rows, d = table.shape
    n = int(node_ids.shape[0])
    if out_dim is None:
        out_dim = d

    if n == 0:                                     # empty-batch guard (no grid=(0,))
        return jnp.zeros((0, out_dim), table.dtype)

    d_pad = _round_up(d, _LANE)
    rows_p = _round_up(rows, _SUBLANE)
    if (rows_p, d_pad) != (rows, d):               # no-op when table is pre-padded
        table = jnp.pad(table, ((0, rows_p - rows), (0, d_pad - d)))

    # Safety clamp against VMEM OOB reads (callers clamp per-type before offsets).
    ids = jnp.clip(node_ids.astype(jnp.int32), 0, rows - 1)

    vmem_cap = _vmem_capacity_bytes()
    resident_budget = int(vmem_cap * 0.4)          # ~51 MiB (128 MiB parts) / ~25 MiB (v7x)
    vmem_limit = int(vmem_cap * 0.75)              # ~96 MiB / ~48 MiB

    table_bytes = rows_p * d_pad * table.dtype.itemsize
    if rows_p <= _ONEHOT_MAX_ROWS and table_bytes <= resident_budget:
        out = _onehot_table_gather(table, ids, vmem_limit_bytes=vmem_limit)
    else:
        out = _rowdma_gather(table, ids, vmem_limit_bytes=vmem_limit)
    return out[:, :out_dim] if out_dim != d_pad else out


class EmbeddingEncoder:
    """JAX/Pallas port of the PyTorch EmbeddingEncoder.

    One embedding table per node type (nn.Embedding semantics, init
    normal_(std=0.01)).  forward() gathers rows for each type's node ids (the
    dgl.NID lookup is replaced by an explicit node_ids_dict).  All node types
    are fused into a single pallas_call per forward via a row offset into a
    concatenated, pre-padded table.
    """

    def __init__(self, num_nodes_per_type: dict, input_dim: int, key):
        self.input_dim = input_dim
        self.emb_dict = {}
        self._row_offset = {}
        self._num_nodes = dict(num_nodes_per_type)
        tables = []
        offset = 0
        for i, ntype in enumerate(sorted(num_nodes_per_type)):
            nnodes = int(num_nodes_per_type[ntype])
            k = jax.random.fold_in(key, i)
            tbl = 0.01 * jax.random.normal(k, (nnodes, input_dim), dtype=jnp.float32)
            self.emb_dict[ntype] = tbl
            self._row_offset[ntype] = offset
            offset += nnodes
            tables.append(tbl)
        fused = jnp.concatenate(tables, axis=0)
        self._total_rows = offset
        # Pad ONCE at init (lane-multiple D, sublane-multiple rows) so forward()
        # never rewrites the whole table through HBM.
        d_pad = _round_up(input_dim, _LANE)
        rows_p = _round_up(offset, _SUBLANE)
        self._fused_table = jnp.pad(
            fused, ((0, rows_p - offset), (0, d_pad - input_dim)))

    def forward(self, node_ids_dict: dict) -> dict:
        types = list(node_ids_dict.keys())
        per_type_ids, counts = [], []
        for t in types:
            ids = jnp.asarray(node_ids_dict[t]).astype(jnp.int32)
            # Clamp per-type BEFORE adding the row offset: an out-of-range id can
            # never read another node type's rows (nn.Embedding would raise).
            ids = jnp.clip(ids, 0, self._num_nodes[t] - 1)
            per_type_ids.append(ids + self._row_offset[t])
            counts.append(int(ids.shape[0]))

        fused_ids = (jnp.concatenate(per_type_ids, axis=0)
                     if per_type_ids else jnp.zeros((0,), jnp.int32))
        fused_out = embedding_lookup(self._fused_table, fused_ids,
                                     out_dim=self.input_dim)

        result, start = {}, 0
        for t, c in zip(types, counts):
            result[t] = fused_out[start:start + c]
            start += c
        return result


if __name__ == "__main__":
    key = jax.random.PRNGKey(0)

    input_dim = 128
    num_nodes_per_type = {"user": 64, "item": 80}

    encoder = EmbeddingEncoder(num_nodes_per_type, input_dim, key)

    # Deterministic "batch graph" node ids per type.
    kid_u, kid_i = jax.random.split(jax.random.fold_in(key, 100))
    node_ids_dict = {
        "user": jax.random.randint(kid_u, (16,), 0, num_nodes_per_type["user"],
                                   dtype=jnp.int32),
        "item": jax.random.randint(kid_i, (16,), 0, num_nodes_per_type["item"],
                                   dtype=jnp.int32),
    }

    out = encoder.forward(node_ids_dict)
    out = jax.tree_util.tree_map(jax.block_until_ready, out)

    # Verify against the plain-JAX reference gather.  The one-hot MXU gather is
    # an exact row selection up to f32 matmul pass rounding, so use a very tight
    # absolute tolerance on std=0.01 values.
    ok = True
    for ntype, ids in node_ids_dict.items():
        ref = encoder.emb_dict[ntype][ids]
        got = out[ntype]
        ok = ok and got.shape == (int(ids.shape[0]), input_dim)
        ok = ok and got.dtype == jnp.float32
        ok = ok and bool(jnp.allclose(got, ref, rtol=0.0, atol=1e-6))

    if ok:
        print("KERNEL_OK")
    else:
        raise SystemExit("mismatch vs reference gather")
</pallas_src>

<mosaic_0001>
module attributes {stable_mosaic.version = 11 : i64} {
  func.func @_onehot_gather_kernel(%arg0: i32, %arg1: memref<32x1xi32, #tpu.memory_space<vmem>>, %arg2: memref<144x128xf32, #tpu.memory_space<vmem>>, %arg3: memref<32x128xf32, #tpu.memory_space<vmem>>) attributes {dimension_semantics = [#tpu.dimension_semantics<parallel>], iteration_bounds = array<i64: 1>, scalar_prefetch = 0 : i64, scratch_operands = 0 : i64, tpu.core_type = #tpu.core_type<tc>, window_params = [{transform_indices = @transform_0, window_bounds = array<i64: 32, 1>}, {pipeline_mode = #tpu.pipeline_mode<synchronous>, transform_indices = @transform_1, window_bounds = array<i64: 144, 128>}, {transform_indices = @transform_2, window_bounds = array<i64: 32, 128>}]} {
    %c0 = arith.constant 0 : index
    %c0_0 = arith.constant 0 : index
    %0 = vector.load %arg1[%c0, %c0_0] : memref<32x1xi32, #tpu.memory_space<vmem>>, vector<32x1xi32>
    %1 = tpu.iota {dimensions = array<i32: 1>} : vector<32x144xi32>
    %2 = vector.broadcast %0 : vector<32x1xi32> to vector<32x144xi32>
    %3 = arith.cmpi eq, %2, %1 : vector<32x144xi32>
    %cst = arith.constant 1.000000e+00 : f32
    %cst_1 = arith.constant 0.000000e+00 : f32
    %4 = vector.broadcast %cst : f32 to vector<32x144xf32>
    %5 = vector.broadcast %cst_1 : f32 to vector<32x144xf32>
    %6 = arith.select %3, %4, %5 : vector<32x144xi1>, vector<32x144xf32>
    %c0_2 = arith.constant 0 : index
    %c0_3 = arith.constant 0 : index
    %7 = vector.load %arg2[%c0_2, %c0_3] : memref<144x128xf32, #tpu.memory_space<vmem>>, vector<144x128xf32>
    %cst_4 = arith.constant dense<0.000000e+00> : vector<32x128xf32>
    %8 = tpu.matmul %6, %7, %cst_4 {dimension_numbers = #tpu.dot_dimension_numbers<[1], [0], [0], [1], [0, 0, 1, 1], [], []>} : vector<32x144xf32>, vector<144x128xf32>, vector<32x128xf32> -> vector<32x128xf32>
    %c0_5 = arith.constant 0 : index
    %c0_6 = arith.constant 0 : index
    %9 = vector.load %arg3[%c0_5, %c0_6] : memref<32x128xf32, #tpu.memory_space<vmem>>, vector<32x128xf32>
    tpu.vector_store %arg3[%c0_5, %c0_6], %8 {strides = array<i32>} : memref<32x128xf32, #tpu.memory_space<vmem>>, vector<32x128xf32>,
    return
  }
  func.func @transform_0(%arg0: i32) -> (i32, i32) {
    %c0_i32 = arith.constant 0 : i32
    %c0_i32_0 = arith.constant 0 : i32
    return %arg0, %c0_i32 : i32, i32
  }
  func.func @transform_1(%arg0: i32) -> (i32, i32) {
    %c0_i32 = arith.constant 0 : i32
    %c0_i32_0 = arith.constant 0 : i32
    %c0_i32_1 = arith.constant 0 : i32
    return %c0_i32, %c0_i32_0 : i32, i32
  }
  func.func @transform_2(%arg0: i32) -> (i32, i32) {
    %c0_i32 = arith.constant 0 : i32
    %c0_i32_0 = arith.constant 0 : i32
    return %arg0, %c0_i32 : i32, i32
  }
}

module attributes {stable_mosaic.version = 11 : i64} {
  func.func @_onehot_gather_kernel(%arg0: i32, %arg1: memref<32x1xi32, #tpu.memory_space<vmem>>, %arg2: memref<144x128xf32, #tpu.memory_space<vmem>>, %arg3: memref<32x128xf32, #tpu.memory_space<vmem>>) attributes {dimension_semantics = [#tpu.dimension_semantics<parallel>], iteration_bounds = array<i64: 1>, scalar_prefetch = 0 : i64, scratch_operands = 0 : i64, tpu.core_type = #tpu.core_type<tc>, window_params = [{transform_indices = @transform_0, window_bounds = array<i64: 32, 1>}, {pipeline_mode = #tpu.pipeline_mode<synchronous>, transform_indices = @transform_1, window_bounds = array<i64: 144, 128>}, {transform_indices = @transform_2, window_bounds = array<i64: 32, 128>}]} {
    %c0 = arith.constant 0 : index
    %c0_0 = arith.constant 0 : index
    %0 = vector.load %arg1[%c0, %c0_0] : memref<32x1xi32, #tpu.memory_space<vmem>>, vector<32x1xi32>
    %1 = tpu.iota {dimensions = array<i32: 1>} : vector<32x144xi32>
    %2 = vector.broadcast %0 : vector<32x1xi32> to vector<32x144xi32>
    %3 = arith.cmpi eq, %2, %1 : vector<32x144xi32>
    %cst = arith.constant 1.000000e+00 : f32
    %cst_1 = arith.constant 0.000000e+00 : f32
    %4 = vector.broadcast %cst : f32 to vector<32x144xf32>
    %5 = vector.broadcast %cst_1 : f32 to vector<32x144xf32>
    %6 = arith.select %3, %4, %5 : vector<32x144xi1>, vector<32x144xf32>
    %c0_2 = arith.constant 0 : index
    %c0_3 = arith.constant 0 : index
    %7 = vector.load %arg2[%c0_2, %c0_3] : memref<144x128xf32, #tpu.memory_space<vmem>>, vector<144x128xf32>
    %cst_4 = arith.constant dense<0.000000e+00> : vector<32x128xf32>
    %8 = tpu.matmul %6, %7, %cst_4 {dimension_numbers = #tpu.dot_dimension_numbers<[1], [0], [0], [1], [0, 0, 1, 1], [], []>} : vector<32x144xf32>, vector<144x128xf32>, vector<32x128xf32> -> vector<32x128xf32>
    %c0_5 = arith.constant 0 : index
    %c0_6 = arith.constant 0 : index
    %9 = vector.load %arg3[%c0_5, %c0_6] : memref<32x128xf32, #tpu.memory_space<vmem>>, vector<32x128xf32>
    tpu.vector_store %arg3[%c0_5, %c0_6], %8 {strides = array<i32>} : memref<32x128xf32, #tpu.memory_space<vmem>>, vector<32x128xf32>,
    return
  }
  func.func @transform_0(%arg0: i32) -> (i32, i32) {
    %c0_i32 = arith.constant 0 : i32
    %c0_i32_0 = arith.constant 0 : i32
    return %arg0, %c0_i32 : i32, i32
  }
  func.func @transform_1(%arg0: i32) -> (i32, i32) {
    %c0_i32 = arith.constant 0 : i32
    %c0_i32_0 = arith.constant 0 : i32
    %c0_i32_1 = arith.constant 0 : i32
    return %c0_i32, %c0_i32_0 : i32, i32
  }
  func.func @transform_2(%arg0: i32) -> (i32, i32) {
    %c0_i32 = arith.constant 0 : i32
    %c0_i32_0 = arith.constant 0 : i32
    return %arg0, %c0_i32 : i32, i32
  }
}

</mosaic_0001>

<bundles_post_ra>
// kernel: tpu_custom_call.1
= control target key start
LH: loop header
LB: loop body
LE: loop exit
PB: predicated region body
PF: predicated region fallthrough
CT: control target
= control target key end

     0   :  { %7 = vsyncpa [#allocation3], 0  ;;  %s326_s0 = inlined_call_operand.vmem [shape: s32[32,1], index: 0, kind: input, shape index: {}]   ;;  %s327_s1 = inlined_call_operand.hbm [shape: f32[144,128], index: 1, kind: input, shape index: {}]   ;;  %s328_s2 = inlined_call_operand.hbm [shape: f32[32,128], index: 2, kind: output, shape index: {}]  }
   0x1   :  { %8 = vsyncpa [#allocation4], 0  ;;  %s15_s11 = sshll.u32 %s327_s1, 4  ;;  %s276_s12 = smov [#allocation2]   ;;  %s16_s11 = int_to_ptr.hbm [resolvable:$true] %s15_s11 }
   0x2   :  { %s17_s13 = sshll.u32 %s276_s12, 4  ;;  %s277_s14 = smov 128   ;;  %s18_s13 = int_to_ptr.vmem [resolvable:$true] %s17_s13 }
   0x3   :  { %s278_s15 = smov 8  }
   0x4   :  { %23 = dma.hbm_to_vmem [thread:$0]  %s16_s11, 2304, %s18_s13, [#allocation3], %s277_s14, %s277_s14, %s278_s15  }
   0x5   :  { %272 = dma.done.wait [#allocation3], 2304  }
   0x6   :  { %273 = vsyncadd [#allocation3], 4294964992  ;;  %v279_v0 = vmov 0   ;;  %v28_v1 = vld [vmem:[%s326_s0] sm:$0xff]  ;;  %v30_v2 = vld [vmem:[%s326_s0 + $0x10] sm:$0xff]  ;;  %v32_v23 = vlaneseq  ;;  %vm81_vm0 = vcmask 130048  }
   0x7   :  { %222 = vset.pattern.permute.xlu0 %v279_v0  ;;  %223 = vset.pattern.permute.xlu1 %v279_v0  ;;  %v78_v3 = vld [vmem:[#allocation2 + $0x78] sm:$0xff]  ;;  %v77_v4 = vld [vmem:[#allocation2 + $0x70] sm:$0xff]  ;;  %v76_v5 = vld [vmem:[#allocation2 + $0x68] sm:$0xff]  ;;  %v280_v28 = vmov 1.0   ;;  %v281_v29 = vmov 0.0   ;;  %s162_s26 = sshll.u32 %s328_s2, 4  ;;  %s163_s26 = int_to_ptr.hbm [resolvable:$true] %s162_s26 }
   0x8   :  { %36 = vperm.xlu0 %222, %v28_v1   ;;  %42 = vperm.xlu1 %223, %v30_v2   ;;  %v75_v6 = vld [vmem:[#allocation2 + $0x60] sm:$0xff]  ;;  %v29_v7 = vld [vmem:[%s326_s0 + $0x8] sm:$0xff]  ;;  %v31_v8 = vld [vmem:[%s326_s0 + $0x18] sm:$0xff]  ;;  %v33_v24 = vand.u32 127, %v32_v23  ;;  %s282_s0 = smov [#allocation5]  }
   0x9   :  { %94 = vmatpush.msra.mxu0 %v78_v3  ;;  %184 = vmatpush.msra.mxu3 %v78_v3  ;;  %v80_v9 = vld [vmem:[#allocation2 + $0x88] sm:$0xff]  ;;  %v74_v10 = vld [vmem:[#allocation2 + $0x58] sm:$0xff]  ;;  %v73_v11 = vld [vmem:[#allocation2 + $0x50] sm:$0xff]  ;;  %s160_s23 = sshll.u32 %s282_s0, 4  ;;  %s161_s23 = int_to_ptr.vmem [resolvable:$true] %s160_s23 }
   0xa   :  { %183 = vmatpush.msra.mxu2 %v78_v3  ;;  %137 = vmatpush.msra.mxu1 %v80_v9  ;;  %v72_v12 = vld [vmem:[#allocation2 + $0x48] sm:$0xff]  ;;  %v71_v13 = vld [vmem:[#allocation2 + $0x40] sm:$0xff]  ;;  %v70_v14 = vld [vmem:[#allocation2 + $0x38] sm:$0xff]  ;;  %v34_v25 = vadd.s32 128, %v33_v24 }
   0xb   :  { %95 = vmatpush.msra.mxu0 %v77_v4  ;;  %186 = vmatpush.msra.mxu3 %v77_v4  ;;  %v69_v15 = vld [vmem:[#allocation2 + $0x30] sm:$0xff]  ;;  %v68_v16 = vld [vmem:[#allocation2 + $0x28] sm:$0xff]  ;;  %v67_v17 = vld [vmem:[#allocation2 + $0x20] sm:$0xff] }
   0xc   :  { %185 = vmatpush.msra.mxu2 %v77_v4  ;;  %v66_v18 = vld [vmem:[#allocation2 + $0x18] sm:$0xff]  ;;  %v65_v19 = vld [vmem:[#allocation2 + $0x10] sm:$0xff]  ;;  %v64_v20 = vld [vmem:[#allocation2 + $0x8] sm:$0xff] }
   0xd   :  { %96 = vmatpush.msra.mxu0 %v76_v5  ;;  %188 = vmatpush.msra.mxu3 %v76_v5  ;;  %v63_v21 = vld [vmem:[#allocation2] sm:$0xff] }
   0xe   :  { %187 = vmatpush.msra.mxu2 %v76_v5  ;;  %v79_v22 = vld [vmem:[#allocation2 + $0x80] sm:$0xff] }
   0xf   :  { %97 = vmatpush.msra.mxu0 %v75_v6  ;;  %190 = vmatpush.msra.mxu3 %v75_v6 }
  0x10   :  { %39 = vperm.xlu0 %222, %v29_v7   ;;  %45 = vperm.xlu1 %223, %v31_v8  }
  0x11   :  { %98 = vmatpush.msra.mxu0 %v74_v10  ;;  %192 = vmatpush.msra.mxu3 %v74_v10 }
  0x12   :  { %189 = vmatpush.msra.mxu2 %v75_v6  ;;  %138 = vmatpush.msra.mxu1 %v79_v22 }
  0x13   :  { %99 = vmatpush.msra.mxu0 %v73_v11  ;;  %194 = vmatpush.msra.mxu3 %v73_v11 }
  0x14   :  { %191 = vmatpush.msra.mxu2 %v74_v10 }
  0x15   :  { %100 = vmatpush.msra.mxu0 %v72_v12  ;;  %196 = vmatpush.msra.mxu3 %v72_v12 }
  0x16   :  { %193 = vmatpush.msra.mxu2 %v73_v11 }
  0x17   :  { %101 = vmatpush.msra.mxu0 %v71_v13  ;;  %198 = vmatpush.msra.mxu3 %v71_v13 }
  0x18   :  { %195 = vmatpush.msra.mxu2 %v72_v12 }
  0x19   :  { %102 = vmatpush.msra.mxu0 %v70_v14  ;;  %200 = vmatpush.msra.mxu3 %v70_v14 }
  0x1a   :  { %197 = vmatpush.msra.mxu2 %v71_v13 }
  0x1b   :  { %103 = vmatpush.msra.mxu0 %v69_v15  ;;  %202 = vmatpush.msra.mxu3 %v69_v15 }
  0x1c   :  { %199 = vmatpush.msra.mxu2 %v70_v14 }
  0x1d   :  { %104 = vmatpush.msra.mxu0 %v68_v16  ;;  %204 = vmatpush.msra.mxu3 %v68_v16 }
  0x1e   :  { %201 = vmatpush.msra.mxu2 %v69_v15 }
  0x1f   :  { %105 = vmatpush.msra.mxu0 %v67_v17  ;;  %206 = vmatpush.msra.mxu3 %v67_v17 }
  0x20   :  { %203 = vmatpush.msra.mxu2 %v68_v16 }
  0x21   :  { %106 = vmatpush.msra.mxu0 %v66_v18  ;;  %208 = vmatpush.msra.mxu3 %v66_v18 }
  0x22   :  { %205 = vmatpush.msra.mxu2 %v67_v17 }
  0x23   :  { %107 = vmatpush.msra.mxu0 %v65_v19  ;;  %210 = vmatpush.msra.mxu3 %v65_v19 }
  0x24   :  { %207 = vmatpush.msra.mxu2 %v66_v18 }
  0x25   :  { %108 = vmatpush.msra.mxu0 %v64_v20  ;;  %212 = vmatpush.msra.mxu3 %v64_v20 }
  0x26   :  { %209 = vmatpush.msra.mxu2 %v65_v19 }
  0x27   :  { %109 = vmatpush.msra.mxu0 %v63_v21  ;;  %214 = vmatpush.msra.mxu3 %v63_v21 }
  0x28   :  { %211 = vmatpush.msra.mxu2 %v64_v20 }
  0x2a   :  { %213 = vmatpush.msra.mxu2 %v63_v21 }
  0x7a   :  { %v37_v26 = vpop.permute.xlu0 %36  ;;  %v43_v27 = vpop.permute.xlu1 %42 }
  0x7b   :  { %vm48_vm1 = vcmp.eq.s32.totalorder %v37_v26, %v34_v25  ;;  %vm47_vm2 = vcmp.eq.s32.totalorder %v37_v26, %v33_v24  ;;  %vm51_vm3 = vcmp.eq.s32.totalorder %v43_v27, %v33_v24  ;;  %vm52_vm7 = vcmp.eq.s32.totalorder %v43_v27, %v34_v25 }
  0x7c   :  { %175 = vmatmul.msk.f32.vlgmr.msra.gmra.mxu0 %vm47_vm2, %v280_v28  ;;  %v56_v30 = vsel %vm48_vm1, 1.0, %v281_v29  ;;  %177 = vmatmul.msk.f32.vlgmr.msra.gmra.mxu3 %vm51_vm3, %v280_v28  ;;  %v60_v34 = vsel %vm52_vm7, 1.0, %v281_v29 }
  0x7d   :  { %179 = vmatmul.msk.f32.vlgmr.msra.gmra.mxu1 %vm81_vm0, %v56_v30 }
  0x82   :  { %v40_v31 = vpop.permute.xlu0 %39  ;;  %v46_v32 = vpop.permute.xlu1 %45 }
  0x83   :  { %vm49_vm4 = vcmp.eq.s32.totalorder %v40_v31, %v33_v24  ;;  %vm50_vm5 = vcmp.eq.s32.totalorder %v40_v31, %v34_v25  ;;  %vm53_vm6 = vcmp.eq.s32.totalorder %v46_v32, %v33_v24  ;;  %vm54_vm8 = vcmp.eq.s32.totalorder %v46_v32, %v34_v25 }
  0x84   :  { %v58_v33 = vsel %vm50_vm5, 1.0, %v281_v29  ;;  %176 = vmatmul.msk.f32.vlgmr.msra.gmra.mxu2 %vm49_vm4, %v280_v28  ;;  %178 = vmatmul.msk.f32.gmra.mxu3 %vm53_vm6, %v280_v28  ;;  %v62_v35 = vsel %vm54_vm8, 1.0, %v281_v29 }
  0x85   :  { %180 = vmatmul.msk.f32.gmra.mxu1 %vm81_vm0, %v58_v33 }
  0x8d   :  { %181 = vmatmul.msk.f32.gmra.mxu1 %vm81_vm0, %v60_v34 }
  0x95   :  { %182 = vmatmul.msk.f32.gmra.mxu1 %vm81_vm0, %v62_v35 }
  0xf9   :  { %v111_v36 = vpop.f32.mrf.mxu0 }
  0xfa   :  { %v140_v37 = vpop.f32.mrf.mxu1 }
  0xfb   :  { %v141_v38 = vadd.f32 %v140_v37, %v111_v36 }
  0xfd   :  { %152 = vst [vmem:[#allocation5] sm:$0xff] %v141_v38 }
  0xff   :  { %v117_v41 = vpop.f32.mrf.mxu3 }
 0x102   :  { %v143_v39 = vpop.f32.mrf.mxu1 }
 0x107   :  { %v114_v40 = vpop.f32.mrf.mxu2  ;;  %v120_v45 = vpop.f32.mrf.mxu3 }
 0x108   :  { %v144_v42 = vadd.f32 %v143_v39, %v114_v40 }
 0x10a   :  { %153 = vst [vmem:[#allocation5 + $0x8] sm:$0xff] %v144_v42  ;;  %v146_v43 = vpop.f32.mrf.mxu1 }
 0x10b   :  { %v147_v44 = vadd.f32 %v146_v43, %v117_v41 }
 0x10d   :  { %154 = vst [vmem:[#allocation5 + $0x10] sm:$0xff] %v147_v44 }
 0x112   :  { %v149_v46 = vpop.f32.mrf.mxu1 }
 0x113   :  { %v150_v47 = vadd.f32 %v149_v46, %v120_v45 }
 0x115   :  { %155 = vst [vmem:[#allocation5 + $0x18] sm:$0xff] %v150_v47 }
 0x116   :  { %168 = dma.vmem_to_hbm [thread:$0]  %s161_s23, 512, %s163_s26, [#allocation4], %s277_s14, %s277_s14, %s278_s15  }
 0x117   :  { %274 = dma.done.wait [#allocation4], 512  }
 0x118   :  { %275 = vsyncadd [#allocation4], 4294966784 }
 0x119   :  { %173 = vsyncpa [#allocation3], 1 }
 0x11a   :  { %174 = vsyncpa [#allocation4], 1 }

// kernel: tpu_custom_call.1
= control target key start
LH: loop header
LB: loop body
LE: loop exit
PB: predicated region body
PF: predicated region fallthrough
CT: control target
= control target key end

     0   :  { %7 = vsyncpa [#allocation3], 0  ;;  %s326_s0 = inlined_call_operand.vmem [shape: s32[32,1], index: 0, kind: input, shape index: {}]   ;;  %s327_s1 = inlined_call_operand.hbm [shape: f32[144,128], index: 1, kind: input, shape index: {}]   ;;  %s328_s2 = inlined_call_operand.hbm [shape: f32[32,128], index: 2, kind: output, shape index: {}]  }
   0x1   :  { %8 = vsyncpa [#allocation4], 0  ;;  %s15_s11 = sshll.u32 %s327_s1, 4  ;;  %s276_s12 = smov [#allocation2]   ;;  %s16_s11 = int_to_ptr.hbm [resolvable:$true] %s15_s11 }
   0x2   :  { %s17_s13 = sshll.u32 %s276_s12, 4  ;;  %s277_s14 = smov 128   ;;  %s18_s13 = int_to_ptr.vmem [resolvable:$true] %s17_s13 }
   0x3   :  { %s278_s15 = smov 8  }
   0x4   :  { %23 = dma.hbm_to_vmem [thread:$0]  %s16_s11, 2304, %s18_s13, [#allocation3], %s277_s14, %s277_s14, %s278_s15  }
   0x5   :  { %272 = dma.done.wait [#allocation3], 2304  }
   0x6   :  { %273 = vsyncadd [#allocation3], 4294964992  ;;  %v279_v0 = vmov 0   ;;  %v28_v1 = vld [vmem:[%s326_s0] sm:$0xff]  ;;  %v30_v2 = vld [vmem:[%s326_s0 + $0x10] sm:$0xff]  ;;  %v32_v23 = vlaneseq  ;;  %vm81_vm0 = vcmask 130048  }
   0x7   :  { %222 = vset.pattern.permute.xlu0 %v279_v0  ;;  %223 = vset.pattern.permute.xlu1 %v279_v0  ;;  %v78_v3 = vld [vmem:[#allocation2 + $0x78] sm:$0xff]  ;;  %v77_v4 = vld [vmem:[#allocation2 + $0x70] sm:$0xff]  ;;  %v76_v5 = vld [vmem:[#allocation2 + $0x68] sm:$0xff]  ;;  %v280_v28 = vmov 1.0   ;;  %v281_v29 = vmov 0.0   ;;  %s162_s26 = sshll.u32 %s328_s2, 4  ;;  %s163_s26 = int_to_ptr.hbm [resolvable:$true] %s162_s26 }
   0x8   :  { %36 = vperm.xlu0 %222, %v28_v1   ;;  %42 = vperm.xlu1 %223, %v30_v2   ;;  %v75_v6 = vld [vmem:[#allocation2 + $0x60] sm:$0xff]  ;;  %v29_v7 = vld [vmem:[%s326_s0 + $0x8] sm:$0xff]  ;;  %v31_v8 = vld [vmem:[%s326_s0 + $0x18] sm:$0xff]  ;;  %v33_v24 = vand.u32 127, %v32_v23  ;;  %s282_s0 = smov [#allocation5]  }
   0x9   :  { %94 = vmatpush.msra.mxu0 %v78_v3  ;;  %184 = vmatpush.msra.mxu3 %v78_v3  ;;  %v80_v9 = vld [vmem:[#allocation2 + $0x88] sm:$0xff]  ;;  %v74_v10 = vld [vmem:[#allocation2 + $0x58] sm:$0xff]  ;;  %v73_v11 = vld [vmem:[#allocation2 + $0x50] sm:$0xff]  ;;  %s160_s23 = sshll.u32 %s282_s0, 4  ;;  %s161_s23 = int_to_ptr.vmem [resolvable:$true] %s160_s23 }
   0xa   :  { %183 = vmatpush.msra.mxu2 %v78_v3  ;;  %137 = vmatpush.msra.mxu1 %v80_v9  ;;  %v72_v12 = vld [vmem:[#allocation2 + $0x48] sm:$0xff]  ;;  %v71_v13 = vld [vmem:[#allocation2 + $0x40] sm:$0xff]  ;;  %v70_v14 = vld [vmem:[#allocation2 + $0x38] sm:$0xff]  ;;  %v34_v25 = vadd.s32 128, %v33_v24 }
   0xb   :  { %95 = vmatpush.msra.mxu0 %v77_v4  ;;  %186 = vmatpush.msra.mxu3 %v77_v4  ;;  %v69_v15 = vld [vmem:[#allocation2 + $0x30] sm:$0xff]  ;;  %v68_v16 = vld [vmem:[#allocation2 + $0x28] sm:$0xff]  ;;  %v67_v17 = vld [vmem:[#allocation2 + $0x20] sm:$0xff] }
   0xc   :  { %185 = vmatpush.msra.mxu2 %v77_v4  ;;  %v66_v18 = vld [vmem:[#allocation2 + $0x18] sm:$0xff]  ;;  %v65_v19 = vld [vmem:[#allocation2 + $0x10] sm:$0xff]  ;;  %v64_v20 = vld [vmem:[#allocation2 + $0x8] sm:$0xff] }
   0xd   :  { %96 = vmatpush.msra.mxu0 %v76_v5  ;;  %188 = vmatpush.msra.mxu3 %v76_v5  ;;  %v63_v21 = vld [vmem:[#allocation2] sm:$0xff] }
   0xe   :  { %187 = vmatpush.msra.mxu2 %v76_v5  ;;  %v79_v22 = vld [vmem:[#allocation2 + $0x80] sm:$0xff] }
   0xf   :  { %97 = vmatpush.msra.mxu0 %v75_v6  ;;  %190 = vmatpush.msra.mxu3 %v75_v6 }
  0x10   :  { %39 = vperm.xlu0 %222, %v29_v7   ;;  %45 = vperm.xlu1 %223, %v31_v8  }
  0x11   :  { %98 = vmatpush.msra.mxu0 %v74_v10  ;;  %192 = vmatpush.msra.mxu3 %v74_v10 }
  0x12   :  { %189 = vmatpush.msra.mxu2 %v75_v6  ;;  %138 = vmatpush.msra.mxu1 %v79_v22 }
  0x13   :  { %99 = vmatpush.msra.mxu0 %v73_v11  ;;  %194 = vmatpush.msra.mxu3 %v73_v11 }
  0x14   :  { %191 = vmatpush.msra.mxu2 %v74_v10 }
  0x15   :  { %100 = vmatpush.msra.mxu0 %v72_v12  ;;  %196 = vmatpush.msra.mxu3 %v72_v12 }
  0x16   :  { %193 = vmatpush.msra.mxu2 %v73_v11 }
  0x17   :  { %101 = vmatpush.msra.mxu0 %v71_v13  ;;  %198 = vmatpush.msra.mxu3 %v71_v13 }
  0x18   :  { %195 = vmatpush.msra.mxu2 %v72_v12 }
  0x19   :  { %102 = vmatpush.msra.mxu0 %v70_v14  ;;  %200 = vmatpush.msra.mxu3 %v70_v14 }
  0x1a   :  { %197 = vmatpush.msra.mxu2 %v71_v13 }
  0x1b   :  { %103 = vmatpush.msra.mxu0 %v69_v15  ;;  %202 = vmatpush.msra.mxu3 %v69_v15 }
  0x1c   :  { %199 = vmatpush.msra.mxu2 %v70_v14 }
  0x1d   :  { %104 = vmatpush.msra.mxu0 %v68_v16  ;;  %204 = vmatpush.msra.mxu3 %v68_v16 }
  0x1e   :  { %201 = vmatpush.msra.mxu2 %v69_v15 }
  0x1f   :  { %105 = vmatpush.msra.mxu0 %v67_v17  ;;  %206 = vmatpush.msra.mxu3 %v67_v17 }
  0x20   :  { %203 = vmatpush.msra.mxu2 %v68_v16 }
  0x21   :  { %106 = vmatpush.msra.mxu0 %v66_v18  ;;  %208 = vmatpush.msra.mxu3 %v66_v18 }
  0x22   :  { %205 = vmatpush.msra.mxu2 %v67_v17 }
  0x23   :  { %107 = vmatpush.msra.mxu0 %v65_v19  ;;  %210 = vmatpush.msra.mxu3 %v65_v19 }
  0x24   :  { %207 = vmatpush.msra.mxu2 %v66_v18 }
  0x25   :  { %108 = vmatpush.msra.mxu0 %v64_v20  ;;  %212 = vmatpush.msra.mxu3 %v64_v20 }
  0x26   :  { %209 = vmatpush.msra.mxu2 %v65_v19 }
  0x27   :  { %109 = vmatpush.msra.mxu0 %v63_v21  ;;  %214 = vmatpush.msra.mxu3 %v63_v21 }
  0x28   :  { %211 = vmatpush.msra.mxu2 %v64_v20 }
  0x2a   :  { %213 = vmatpush.msra.mxu2 %v63_v21 }
  0x7a   :  { %v37_v26 = vpop.permute.xlu0 %36  ;;  %v43_v27 = vpop.permute.xlu1 %42 }
  0x7b   :  { %vm48_vm1 = vcmp.eq.s32.totalorder %v37_v26, %v34_v25  ;;  %vm47_vm2 = vcmp.eq.s32.totalorder %v37_v26, %v33_v24  ;;  %vm51_vm3 = vcmp.eq.s32.totalorder %v43_v27, %v33_v24  ;;  %vm52_vm7 = vcmp.eq.s32.totalorder %v43_v27, %v34_v25 }
  0x7c   :  { %175 = vmatmul.msk.f32.vlgmr.msra.gmra.mxu0 %vm47_vm2, %v280_v28  ;;  %v56_v30 = vsel %vm48_vm1, 1.0, %v281_v29  ;;  %177 = vmatmul.msk.f32.vlgmr.msra.gmra.mxu3 %vm51_vm3, %v280_v28  ;;  %v60_v34 = vsel %vm52_vm7, 1.0, %v281_v29 }
  0x7d   :  { %179 = vmatmul.msk.f32.vlgmr.msra.gmra.mxu1 %vm81_vm0, %v56_v30 }
  0x82   :  { %v40_v31 = vpop.permute.xlu0 %39  ;;  %v46_v32 = vpop.permute.xlu1 %45 }
  0x83   :  { %vm49_vm4 = vcmp.eq.s32.totalorder %v40_v31, %v33_v24  ;;  %vm50_vm5 = vcmp.eq.s32.totalorder %v40_v31, %v34_v25  ;;  %vm53_vm6 = vcmp.eq.s32.totalorder %v46_v32, %v33_v24  ;;  %vm54_vm8 = vcmp.eq.s32.totalorder %v46_v32, %v34_v25 }
  0x84   :  { %v58_v33 = vsel %vm50_vm5, 1.0, %v281_v29  ;;  %176 = vmatmul.msk.f32.vlgmr.msra.gmra.mxu2 %vm49_vm4, %v280_v28  ;;  %178 = vmatmul.msk.f32.gmra.mxu3 %vm53_vm6, %v280_v28  ;;  %v62_v35 = vsel %vm54_vm8, 1.0, %v281_v29 }
  0x85   :  { %180 = vmatmul.msk.f32.gmra.mxu1 %vm81_vm0, %v58_v33 }
  0x8d   :  { %181 = vmatmul.msk.f32.gmra.mxu1 %vm81_vm0, %v60_v34 }
  0x95   :  { %182 = vmatmul.msk.f32.gmra.mxu1 %vm81_vm0, %v62_v35 }
  0xf9   :  { %v111_v36 = vpop.f32.mrf.mxu0 }
  0xfa   :  { %v140_v37 = vpop.f32.mrf.mxu1 }
  0xfb   :  { %v141_v38 = vadd.f32 %v140_v37, %v111_v36 }
  0xfd   :  { %152 = vst [vmem:[#allocation5] sm:$0xff] %v141_v38 }
  0xff   :  { %v117_v41 = vpop.f32.mrf.mxu3 }
 0x102   :  { %v143_v39 = vpop.f32.mrf.mxu1 }
 0x107   :  { %v114_v40 = vpop.f32.mrf.mxu2  ;;  %v120_v45 = vpop.f32.mrf.mxu3 }
 0x108   :  { %v144_v42 = vadd.f32 %v143_v39, %v114_v40 }
 0x10a   :  { %153 = vst [vmem:[#allocation5 + $0x8] sm:$0xff] %v144_v42  ;;  %v146_v43 = vpop.f32.mrf.mxu1 }
 0x10b   :  { %v147_v44 = vadd.f32 %v146_v43, %v117_v41 }
 0x10d   :  { %154 = vst [vmem:[#allocation5 + $0x10] sm:$0xff] %v147_v44 }
 0x112   :  { %v149_v46 = vpop.f32.mrf.mxu1 }
 0x113   :  { %v150_v47 = vadd.f32 %v149_v46, %v120_v45 }
 0x115   :  { %155 = vst [vmem:[#allocation5 + $0x18] sm:$0xff] %v150_v47 }
 0x116   :  { %168 = dma.vmem_to_hbm [thread:$0]  %s161_s23, 512, %s163_s26, [#allocation4], %s277_s14, %s277_s14, %s278_s15  }
 0x117   :  { %274 = dma.done.wait [#allocation4], 512  }
 0x118   :  { %275 = vsyncadd [#allocation4], 4294966784 }
 0x119   :  { %173 = vsyncpa [#allocation3], 1 }
 0x11a   :  { %174 = vsyncpa [#allocation4], 1 }

</bundles_post_ra>
